<compile_context>
chip_gen: v7x
topology: tpu7x:2x2x1
jax: 0.10.0
libtpu: 0.0.40
codegen_flags: <defaults>
</compile_context>

<pallas_src>
import jax
import jax.numpy as jnp
from jax.experimental import pallas as pl
from jax.experimental.pallas import tpu as pltpu

_LANE = 128      # lane width (last dim alignment)
_SUBLANE = 8     # sublane width (second-to-last dim alignment, f32)


def _round_up(x: int, m: int) -> int:
    return ((x + m - 1) // m) * m


def _make_fused_encoder_kernel(num_layers: int):
    """Kernel: o = silu(...silu(silu(x @ W0 + b0) @ W1 + b1)... ) for one batch tile."""

    def kernel(x_ref, *refs):
        o_ref = refs[-1]
        wb_refs = refs[:-1]                      # (w0, b0, w1, b1, ...)
        h = x_ref[...].astype(jnp.float32)       # (TB, D0_p)
        for l in range(num_layers):
            w = wb_refs[2 * l][...]                          # bf16 (Dl_p, Dl1_p)
            b = wb_refs[2 * l + 1][...].astype(jnp.float32)  # (1, Dl1_p)
            # bf16 inputs -> MXU, f32 accumulation.
            z = jnp.dot(h.astype(jnp.bfloat16), w,
                        preferred_element_type=jnp.float32)
            z = z + b
            # SiLU in f32: exp lowers to the EUP slot.
            h = z * jax.nn.sigmoid(z)
        o_ref[...] = h.astype(o_ref.dtype)

    return kernel


def encoder_net_forward(x, params, aug: bool = False, batch_tile: int = 256):
    """EncoderNet.forward as a single fused Pallas call.

    x:      (B, state_dim) f32
    params: list of (W(in,out), b(out,)) per layer.
    """
    if aug:
        # TODO(synk): training-mode dropout not implemented (inference-only path).
        raise NotImplementedError("training-mode dropout (aug=True) not implemented")

    B, din0 = x.shape
    num_layers = len(params)
    dims = [din0] + [w.shape[1] for (w, _) in params]
    padded = [max(_LANE, _round_up(d, _LANE)) for d in dims]  # lane-dense feature dims

    # Batch tiling: TB >= 8 (sublane); cap at `batch_tile` for large batches.
    b8 = _round_up(B, _SUBLANE)
    tb = batch_tile if b8 >= batch_tile else b8
    b_pad = _round_up(b8, tb)

    in_dtype = x.dtype
    itemsize = jnp.dtype(in_dtype).itemsize

    # Pad activations and parameters (zeros in the padding -> math is exact).
    x_p = jnp.zeros((b_pad, padded[0]), in_dtype).at[:B, :din0].set(x)

    flat_inputs = [x_p]
    in_specs = [pl.BlockSpec((tb, padded[0]), lambda i: (i, 0))]
    param_bytes = 0
    for l, (w, b) in enumerate(params):
        din, dout = w.shape
        dinp, doutp = padded[l], padded[l + 1]
        w_p = jnp.zeros((dinp, doutp), jnp.bfloat16).at[:din, :dout].set(
            w.astype(jnp.bfloat16))
        b_p = jnp.zeros((1, doutp), jnp.float32).at[0, :dout].set(
            b.astype(jnp.float32))
        flat_inputs += [w_p, b_p]
        in_specs += [
            pl.BlockSpec((dinp, doutp), lambda i: (0, 0)),  # resident across grid
            pl.BlockSpec((1, doutp), lambda i: (0, 0)),
        ]
        param_bytes += w_p.size * 2 + b_p.size * 4

    out_spec = pl.BlockSpec((tb, padded[-1]), lambda i: (i, 0))

    # Advisory cost estimate for XLA scheduling.
    flops = sum(2 * b_pad * padded[l] * padded[l + 1] for l in range(num_layers))
    transcendentals = sum(b_pad * padded[l + 1] for l in range(num_layers))
    bytes_accessed = (x_p.size * itemsize + param_bytes
                      + b_pad * padded[-1] * itemsize)

    # VMEM budget: double-buffered x/out tiles + (possibly double-buffered) params
    # + f32 intermediates; clamp under v7x's 64 MiB physical VMEM.
    vmem_needed = (2 * tb * padded[0] * itemsize
                   + 2 * tb * padded[-1] * itemsize
                   + 2 * param_bytes
                   + 4 * tb * max(padded) * 4)
    vmem_limit = int(min(max(2 * vmem_needed, 16 * 2**20), 48 * 2**20))

    out_padded = pl.pallas_call(
        _make_fused_encoder_kernel(num_layers),
        out_shape=jax.ShapeDtypeStruct((b_pad, padded[-1]), in_dtype),
        grid=(b_pad // tb,),
        in_specs=in_specs,
        out_specs=out_spec,
        compiler_params=pltpu.CompilerParams(
            dimension_semantics=("parallel",),
            vmem_limit_bytes=vmem_limit,
        ),
        cost_estimate=pl.CostEstimate(
            flops=flops,
            transcendentals=transcendentals,
            bytes_accessed=bytes_accessed,
        ),
    )(*flat_inputs)

    # F.dropout(x, p=0.25, training=aug) is identity for aug=False.
    return out_padded[:B, :dims[-1]]


def init_encoder_params(state_dim, hidden_dims, key, dtype=jnp.float32):
    """Deterministic parameter init (Kaiming-uniform-ish, like nn.Linear default)."""
    params = []
    dim = state_dim
    for h in hidden_dims:
        key, kw, kb = jax.random.split(key, 3)
        bound = 1.0 / (dim ** 0.5)
        w = jax.random.uniform(kw, (dim, h), dtype, minval=-bound, maxval=bound)
        b = jax.random.uniform(kb, (h,), dtype, minval=-bound, maxval=bound)
        params.append((w, b))
        dim = h
    return params


if __name__ == "__main__":
    key = jax.random.PRNGKey(0)
    batch = 8
    state_dim = 16
    hidden_dims = [32, 64]

    key, kx, kp = jax.random.split(key, 3)
    x = jax.random.normal(kx, (batch, state_dim), dtype=jnp.float32)
    params = init_encoder_params(state_dim, hidden_dims, kp)

    out = encoder_net_forward(x, params, aug=False)
    out = jax.block_until_ready(out)

    # Pure-JAX reference with the same precision policy
    # (bf16 matmul inputs, f32 accumulation, f32 bias + SiLU).
    ref = x
    for (w, b) in params:
        z = jnp.dot(ref.astype(jnp.bfloat16), w.astype(jnp.bfloat16),
                    preferred_element_type=jnp.float32) + b.astype(jnp.float32)
        ref = z * jax.nn.sigmoid(z)

    assert out.shape == (batch, hidden_dims[-1])
    max_err = float(jnp.max(jnp.abs(out - ref)))
    assert jnp.allclose(out, ref, atol=1e-4, rtol=1e-4), f"max_err={max_err}"

    print("KERNEL_OK")
</pallas_src>

<mosaic_0001>
module attributes {stable_mosaic.version = 11 : i64} {
  func.func @kernel(%arg0: i32, %arg1: memref<8x128xf32, #tpu.memory_space<vmem>>, %arg2: memref<128x128xbf16, #tpu.memory_space<vmem>>, %arg3: memref<1x128xf32, #tpu.memory_space<vmem>>, %arg4: memref<128x128xbf16, #tpu.memory_space<vmem>>, %arg5: memref<1x128xf32, #tpu.memory_space<vmem>>, %arg6: memref<8x128xf32, #tpu.memory_space<vmem>>) attributes {dimension_semantics = [#tpu.dimension_semantics<parallel>], iteration_bounds = array<i64: 1>, scalar_prefetch = 0 : i64, scratch_operands = 0 : i64, tpu.core_type = #tpu.core_type<tc>, window_params = [{transform_indices = @transform_0, window_bounds = array<i64: 8, 128>}, {pipeline_mode = #tpu.pipeline_mode<synchronous>, transform_indices = @transform_1, window_bounds = array<i64: 128, 128>}, {pipeline_mode = #tpu.pipeline_mode<synchronous>, transform_indices = @transform_2, window_bounds = array<i64: 1, 128>}, {pipeline_mode = #tpu.pipeline_mode<synchronous>, transform_indices = @transform_3, window_bounds = array<i64: 128, 128>}, {pipeline_mode = #tpu.pipeline_mode<synchronous>, transform_indices = @transform_4, window_bounds = array<i64: 1, 128>}, {transform_indices = @transform_5, window_bounds = array<i64: 8, 128>}]} {
    %c0 = arith.constant 0 : index
    %c0_0 = arith.constant 0 : index
    %0 = vector.load %arg1[%c0, %c0_0] : memref<8x128xf32, #tpu.memory_space<vmem>>, vector<8x128xf32>
    %c0_1 = arith.constant 0 : index
    %c0_2 = arith.constant 0 : index
    %1 = vector.load %arg2[%c0_1, %c0_2] : memref<128x128xbf16, #tpu.memory_space<vmem>>, vector<128x128xbf16>
    %c0_3 = arith.constant 0 : index
    %c0_4 = arith.constant 0 : index
    %2 = vector.load %arg3[%c0_3, %c0_4] : memref<1x128xf32, #tpu.memory_space<vmem>>, vector<1x128xf32>
    %3 = arith.truncf %0 : vector<8x128xf32> to vector<8x128xbf16>
    %cst = arith.constant dense<0.000000e+00> : vector<8x128xf32>
    %4 = tpu.matmul %3, %1, %cst {dimension_numbers = #tpu.dot_dimension_numbers<[1], [0], [0], [1], [0, 0, 1, 1], [], []>} : vector<8x128xbf16>, vector<128x128xbf16>, vector<8x128xf32> -> vector<8x128xf32>
    %5 = vector.broadcast %2 : vector<1x128xf32> to vector<8x128xf32>
    %6 = arith.addf %4, %5 : vector<8x128xf32>
    %7 = arith.negf %6 : vector<8x128xf32>
    %8 = math.exp %7 : vector<8x128xf32>
    %cst_5 = arith.constant 1.000000e+00 : f32
    %9 = vector.broadcast %cst_5 : f32 to vector<8x128xf32>
    %10 = arith.addf %9, %8 : vector<8x128xf32>
    %11 = arith.divf %9, %10 : vector<8x128xf32>
    %12 = arith.mulf %6, %11 : vector<8x128xf32>
    %c0_6 = arith.constant 0 : index
    %c0_7 = arith.constant 0 : index
    %13 = vector.load %arg4[%c0_6, %c0_7] : memref<128x128xbf16, #tpu.memory_space<vmem>>, vector<128x128xbf16>
    %c0_8 = arith.constant 0 : index
    %c0_9 = arith.constant 0 : index
    %14 = vector.load %arg5[%c0_8, %c0_9] : memref<1x128xf32, #tpu.memory_space<vmem>>, vector<1x128xf32>
    %15 = arith.truncf %12 : vector<8x128xf32> to vector<8x128xbf16>
    %cst_10 = arith.constant dense<0.000000e+00> : vector<8x128xf32>
    %16 = tpu.matmul %15, %13, %cst_10 {dimension_numbers = #tpu.dot_dimension_numbers<[1], [0], [0], [1], [0, 0, 1, 1], [], []>} : vector<8x128xbf16>, vector<128x128xbf16>, vector<8x128xf32> -> vector<8x128xf32>
    %17 = vector.broadcast %14 : vector<1x128xf32> to vector<8x128xf32>
    %18 = arith.addf %16, %17 : vector<8x128xf32>
    %19 = arith.negf %18 : vector<8x128xf32>
    %20 = math.exp %19 : vector<8x128xf32>
    %cst_11 = arith.constant 1.000000e+00 : f32
    %21 = vector.broadcast %cst_11 : f32 to vector<8x128xf32>
    %22 = arith.addf %21, %20 : vector<8x128xf32>
    %23 = arith.divf %21, %22 : vector<8x128xf32>
    %24 = arith.mulf %18, %23 : vector<8x128xf32>
    %c0_12 = arith.constant 0 : index
    %c0_13 = arith.constant 0 : index
    %25 = vector.load %arg6[%c0_12, %c0_13] : memref<8x128xf32, #tpu.memory_space<vmem>>, vector<8x128xf32>
    tpu.vector_store %arg6[%c0_12, %c0_13], %24 {strides = array<i32>} : memref<8x128xf32, #tpu.memory_space<vmem>>, vector<8x128xf32>,
    return
  }
  func.func @transform_0(%arg0: i32) -> (i32, i32) {
    %c0_i32 = arith.constant 0 : i32
    %c0_i32_0 = arith.constant 0 : i32
    return %arg0, %c0_i32 : i32, i32
  }
  func.func @transform_1(%arg0: i32) -> (i32, i32) {
    %c0_i32 = arith.constant 0 : i32
    %c0_i32_0 = arith.constant 0 : i32
    %c0_i32_1 = arith.constant 0 : i32
    return %c0_i32, %c0_i32_0 : i32, i32
  }
  func.func @transform_2(%arg0: i32) -> (i32, i32) {
    %c0_i32 = arith.constant 0 : i32
    %c0_i32_0 = arith.constant 0 : i32
    %c0_i32_1 = arith.constant 0 : i32
    return %c0_i32, %c0_i32_0 : i32, i32
  }
  func.func @transform_3(%arg0: i32) -> (i32, i32) {
    %c0_i32 = arith.constant 0 : i32
    %c0_i32_0 = arith.constant 0 : i32
    %c0_i32_1 = arith.constant 0 : i32
    return %c0_i32, %c0_i32_0 : i32, i32
  }
  func.func @transform_4(%arg0: i32) -> (i32, i32) {
    %c0_i32 = arith.constant 0 : i32
    %c0_i32_0 = arith.constant 0 : i32
    %c0_i32_1 = arith.constant 0 : i32
    return %c0_i32, %c0_i32_0 : i32, i32
  }
  func.func @transform_5(%arg0: i32) -> (i32, i32) {
    %c0_i32 = arith.constant 0 : i32
    %c0_i32_0 = arith.constant 0 : i32
    return %arg0, %c0_i32 : i32, i32
  }
}

</mosaic_0001>

<bundles_post_ra>
// kernel: tpu_custom_call.1
= control target key start
LH: loop header
LB: loop body
LE: loop exit
PB: predicated region body
PF: predicated region fallthrough
CT: control target
= control target key end

     0   :  { %10 = vsyncpa [#allocation3], 0  ;;  %s619_s0 = inlined_call_operand.hbm [shape: f32[8,128], index: 0, kind: input, shape index: {}]   ;;  %s620_s1 = inlined_call_operand.hbm [shape: bf16[128,128], index: 1, kind: input, shape index: {}]   ;;  %s621_s2 = inlined_call_operand.vmem [shape: f32[1,128], index: 2, kind: input, shape index: {}]   ;;  %s622_s3 = inlined_call_operand.hbm [shape: bf16[128,128], index: 3, kind: input, shape index: {}]   ;;  %s623_s4 = inlined_call_operand.vmem [shape: f32[1,128], index: 4, kind: input, shape index: {}]   ;;  %s624_s5 = inlined_call_operand.hbm [shape: f32[8,128], index: 5, kind: output, shape index: {}]  }
   0x1   :  { %11 = vsyncpa [#allocation6], 0 }
   0x2   :  { %12 = vsyncpa [#allocation4], 0  ;;  %s521_s18 = smov [#allocation5]   ;;  %s427_s22 = scalar_lea.hbm %s620_s1, 1024 }
   0x3   :  { %s28_s19 = sshll.u32 %s521_s18, 4  ;;  %p428_p0 = scmp.ne.s32.totalorder %s620_s1, %s427_s22  ;;  %s29_s19 = int_to_ptr.vmem [resolvable:$true] %s28_s19 }
   0x4   :  { %p431_p1 = scmp.lt.u32.totalorder %s427_s22, %s620_s1 }
   0x6   :  { %p433_p2 = pnand %p431_p1, %p428_p0 }
   0x8   :  { %436 = shalt.err (!%p433_p2)
}
   0x9   :  { %s437_s27 = scalar_lea.vmem %s29_s19, 1024  ;;  %p442_p4 = scmp.lt.s32.totalorder %s29_s19, %s29_s19 }
   0xa   :  { %p438_p3 = scmp.ne.s32.totalorder %s29_s19, %s437_s27  ;;  %p443_p5 = scmp.lt.s32.totalorder %s437_s27, %s437_s27 }
   0xc   :  { %p444_p6 = por %p443_p5, %p442_p4 }
   0xe   :  { %p445_p7 = pnand %p444_p6, %p438_p3 }
  0x10   :  { %448 = shalt.err (!%p445_p7)
}
  0x11   :  { %s522_s28 = smov 64   ;;  %s523_s29 = smov 4  }
  0x12   :  { %34 = dma.hbm_to_vmem [thread:$0]  %s620_s1, 1024, %s29_s19, [#allocation6], %s522_s28, %s522_s28, %s523_s29  }
  0x13   :  { %s524_s7 = smov [#allocation2]   ;;  %s525_s9 = smov [#allocation7]  }
  0x14   :  { %s19_s8 = sshll.u32 %s524_s7, 4  ;;  %s42_s10 = sshll.u32 %s525_s9, 4  ;;  %s20_s8 = int_to_ptr.vmem [resolvable:$true] %s19_s8  ;;  %s43_s10 = int_to_ptr.vmem [resolvable:$true] %s42_s10 }
  0x15   :  { %s449_s13 = scalar_lea.hbm %s619_s0, 128 }
  0x16   :  { %p450_p8 = scmp.ne.s32.totalorder %s619_s0, %s449_s13  ;;  %p453_p9 = scmp.lt.u32.totalorder %s449_s13, %s619_s0 }
  0x18   :  { %p455_p10 = pnand %p453_p9, %p450_p8 }
  0x1a   :  { %458 = shalt.err (!%p455_p10)
}
  0x1b   :  { %s459_s1 = scalar_lea.vmem %s20_s8, 128  ;;  %p464_p12 = scmp.lt.s32.totalorder %s20_s8, %s20_s8 }
  0x1c   :  { %p460_p11 = scmp.ne.s32.totalorder %s20_s8, %s459_s1  ;;  %p465_p13 = scmp.lt.s32.totalorder %s459_s1, %s459_s1 }
  0x1e   :  { %p466_p0 = por %p465_p13, %p464_p12 }
  0x20   :  { %p467_p1 = pnand %p466_p0, %p460_p11 }
  0x22   :  { %470 = shalt.err (!%p467_p1)
}
  0x23   :  { %22 = dma.hbm_to_vmem [thread:$0]  %s619_s0, 128, %s20_s8, [#allocation3]  }
  0x24   :  { %s471_s22 = scalar_lea.hbm %s622_s3, 1024 }
  0x25   :  { %p472_p2 = scmp.ne.s32.totalorder %s622_s3, %s471_s22  ;;  %p475_p3 = scmp.lt.u32.totalorder %s471_s22, %s622_s3 }
  0x27   :  { %p477_p4 = pnand %p475_p3, %p472_p2 }
  0x29   :  { %480 = shalt.err (!%p477_p4)
}
  0x2a   :  { %s481_s27 = scalar_lea.vmem %s43_s10, 1024  ;;  %p486_p6 = scmp.lt.s32.totalorder %s43_s10, %s43_s10 }
  0x2b   :  { %p482_p5 = scmp.ne.s32.totalorder %s43_s10, %s481_s27  ;;  %p487_p7 = scmp.lt.s32.totalorder %s481_s27, %s481_s27 }
  0x2d   :  { %p488_p8 = por %p487_p7, %p486_p6 }
  0x2f   :  { %p489_p9 = pnand %p488_p8, %p482_p5 }
  0x31   :  { %492 = shalt.err (!%p489_p9)
}
  0x32   :  { %48 = dma.hbm_to_vmem [thread:$0]  %s622_s3, 1024, %s43_s10, [#allocation6], %s522_s28, %s522_s28, %s523_s29  }
  0x33   :  { %515 = dma.done.wait [#allocation3], 128  }
  0x34   :  { %516 = vsyncadd [#allocation3], 4294967168 }
  0x35   :  { %517 = dma.done.wait [#allocation6], 2048  }
  0x36   :  { %518 = vsyncadd [#allocation6], 4294965248  ;;  %v526_v0 = vmov 0.0   ;;  %vm527_vm0 = vmmov 0   ;;  %v403_v1 = vld [vmem:[#allocation5] sm:$0xff]   ;;  %v404_v2 = vld [vmem:[#allocation5 + $0x8] sm:$0xff]  }
  0x37   :  { %355 = vmatprep.subr.bf16.mxu0 %v526_v0  ;;  %371 = vmatprep.mubr.msk.bf16.mxu0 %vm527_vm0, %v526_v0  ;;  %v405_v3 = vld [vmem:[#allocation5 + $0x10] sm:$0xff]   ;;  %v406_v4 = vld [vmem:[#allocation5 + $0x18] sm:$0xff]   ;;  %v407_v5 = vld [vmem:[#allocation5 + $0x20] sm:$0xff]  }
  0x38   :  { %375 = vmatprep.subr.bf16.mxu1 %v526_v0  ;;  %391 = vmatprep.mubr.msk.bf16.mxu1 %vm527_vm0, %v526_v0  ;;  %v408_v6 = vld [vmem:[#allocation5 + $0x28] sm:$0xff]   ;;  %v409_v7 = vld [vmem:[#allocation5 + $0x30] sm:$0xff]   ;;  %v410_v8 = vld [vmem:[#allocation5 + $0x38] sm:$0xff]  }
  0x39   :  { %356 = vmatpush3.bf16.msra.mxu0 %v403_v1  ;;  %v61_v9 = vld [vmem:[#allocation2] sm:$0xff]  ;;  %v411_v11 = vld [vmem:[#allocation7] sm:$0xff]   ;;  %v412_v12 = vld [vmem:[#allocation7 + $0x8] sm:$0xff]  }
  0x3a   :  { %357 = vmatprep.subr.bf16.mxu0 %v526_v0  ;;  %v79_v10 = vpack.c.bf16 %v61_v9, %v61_v9  ;;  %376 = vmatpush3.bf16.msra.mxu1 %v411_v11  ;;  %v413_v13 = vld [vmem:[#allocation7 + $0x10] sm:$0xff]   ;;  %v414_v14 = vld [vmem:[#allocation7 + $0x18] sm:$0xff]   ;;  %v415_v15 = vld [vmem:[#allocation7 + $0x20] sm:$0xff]  }
  0x3b   :  { %377 = vmatprep.subr.bf16.mxu1 %v526_v0  ;;  %v416_v16 = vld [vmem:[#allocation7 + $0x28] sm:$0xff]   ;;  %v417_v17 = vld [vmem:[#allocation7 + $0x30] sm:$0xff]   ;;  %v418_v18 = vld [vmem:[#allocation7 + $0x38] sm:$0xff]  }
  0x3c   :  { %v317_v19 = vld [vmem:[%s621_s2] ss:$0 sm:$0xff]  ;;  %s528_s2 = smov [#allocation8]  }
  0x3d   :  { %358 = vmatpush3.bf16.msra.mxu0 %v404_v2  ;;  %v327_v31 = vld [vmem:[%s623_s4] ss:$0 sm:$0xff]  ;;  %s307_s7 = sshll.u32 %s528_s2, 4  ;;  %s308_s7 = int_to_ptr.vmem [resolvable:$true] %s307_s7 }
  0x3e   :  { %359 = vmatprep.subr.bf16.mxu0 %v526_v0  ;;  %378 = vmatpush3.bf16.msra.mxu1 %v412_v12  ;;  %s493_s8 = scalar_lea.vmem %s308_s7, 128  ;;  %p498_p11 = scmp.lt.s32.totalorder %s308_s7, %s308_s7 }
  0x3f   :  { %379 = vmatprep.subr.bf16.mxu1 %v526_v0  ;;  %p494_p10 = scmp.ne.s32.totalorder %s308_s7, %s493_s8  ;;  %p499_p12 = scmp.lt.s32.totalorder %s493_s8, %s493_s8 }
  0x41   :  { %360 = vmatpush3.bf16.msra.mxu0 %v405_v3  ;;  %p500_p13 = por %p499_p12, %p498_p11 }
  0x42   :  { %361 = vmatprep.subr.bf16.mxu0 %v526_v0  ;;  %380 = vmatpush3.bf16.msra.mxu1 %v413_v13 }
  0x43   :  { %381 = vmatprep.subr.bf16.mxu1 %v526_v0  ;;  %p501_p0 = pnand %p500_p13, %p494_p10 }
  0x45   :  { %362 = vmatpush3.bf16.msra.mxu0 %v406_v4 }
  0x46   :  { %363 = vmatprep.subr.bf16.mxu0 %v526_v0  ;;  %382 = vmatpush3.bf16.msra.mxu1 %v414_v14 }
  0x47   :  { %383 = vmatprep.subr.bf16.mxu1 %v526_v0 }
  0x49   :  { %364 = vmatpush3.bf16.msra.mxu0 %v407_v5 }
  0x4a   :  { %365 = vmatprep.subr.bf16.mxu0 %v526_v0  ;;  %384 = vmatpush3.bf16.msra.mxu1 %v415_v15 }
  0x4b   :  { %385 = vmatprep.subr.bf16.mxu1 %v526_v0 }
  0x4d   :  { %366 = vmatpush3.bf16.msra.mxu0 %v408_v6 }
  0x4e   :  { %367 = vmatprep.subr.bf16.mxu0 %v526_v0  ;;  %386 = vmatpush3.bf16.msra.mxu1 %v416_v16 }
  0x4f   :  { %387 = vmatprep.subr.bf16.mxu1 %v526_v0 }
  0x51   :  { %368 = vmatpush3.bf16.msra.mxu0 %v409_v7 }
  0x52   :  { %369 = vmatprep.subr.bf16.mxu0 %v526_v0  ;;  %388 = vmatpush3.bf16.msra.mxu1 %v417_v17 }
  0x53   :  { %389 = vmatprep.subr.bf16.mxu1 %v526_v0 }
  0x55   :  { %370 = vmatpush3.bf16.msra.mxu0 %v410_v8 }
  0x56   :  { %390 = vmatpush3.bf16.msra.mxu1 %v418_v18 }
  0x58   :  { %372 = vmatmul.mubr.bf16.vlgmr.msra.gmra.mrb[0].mxu0 %v79_v10 }
 0x12b   :  { %v168_v20 = vpop.f32.mrb[0].mxu0 }
 0x12c   :  { %v169_v21 = vadd.f32 %v317_v19, %v168_v20  ;;  %v373_v22 = vpop.f32.mrb[1].mxu0 }
 0x12d   :  { %v171_v23 = vpop.f32.mrb[2].mxu0 }
 0x12e   :  { %v326_v24 = vmul.f32 -1.442695, %v169_v21  ;;  %v374_v25 = vpop.f32.mrb[3].mxu0 }
 0x130   :  { %419 = vpow2.f32 %v326_v24 }
 0x13a   :  { %v420_v26 = vpop.eup %419 }
 0x13b   :  { %v177_v27 = vadd.f32 1.0, %v420_v26 }
 0x13d   :  { %421 = vrcp.f32 %v177_v27 }
 0x147   :  { %v422_v28 = vpop.eup %421 }
 0x148   :  { %v180_v29 = vmul.f32 %v422_v28, %v169_v21 }
 0x14a   :  { %v198_v30 = vpack.c.bf16 %v180_v29, %v180_v29 }
 0x14c   :  { %392 = vmatmul.mubr.bf16.vlgmr.msra.gmra.mrb[0].mxu1 %v198_v30 }
 0x21f   :  { %v287_v32 = vpop.f32.mrb[0].mxu1 }
 0x220   :  { %v288_v33 = vadd.f32 %v327_v31, %v287_v32  ;;  %v393_v34 = vpop.f32.mrb[1].mxu1 }
 0x221   :  { %v290_v35 = vpop.f32.mrb[2].mxu1 }
 0x222   :  { %v336_v36 = vmul.f32 -1.442695, %v288_v33  ;;  %v394_v37 = vpop.f32.mrb[3].mxu1 }
 0x224   :  { %423 = vpow2.f32 %v336_v36 }
 0x22e   :  { %v424_v38 = vpop.eup %423 }
 0x22f   :  { %v296_v39 = vadd.f32 1.0, %v424_v38 }
 0x231   :  { %425 = vrcp.f32 %v296_v39 }
 0x23b   :  { %v426_v40 = vpop.eup %425 }
 0x23c   :  { %v299_v41 = vmul.f32 %v426_v40, %v288_v33 }
 0x23e   :  { %300 = vst [vmem:[#allocation8] sm:$0xff] %v299_v41 }
 0x23f   :  { %504 = shalt.err (!%p501_p0)
}
 0x240   :  { %s505_s10 = scalar_lea.hbm %s624_s5, 128 }
 0x241   :  { %p506_p1 = scmp.ne.s32.totalorder %s624_s5, %s505_s10  ;;  %p509_p2 = scmp.lt.u32.totalorder %s505_s10, %s624_s5 }
 0x243   :  { %p511_p3 = pnand %p509_p2, %p506_p1 }
 0x245   :  { %514 = shalt.err (!%p511_p3)
}
 0x246   :  { %310 = dma.vmem_to_hbm [thread:$0]  %s308_s7, 128, %s624_s5, [#allocation4]  }
 0x247   :  { %519 = dma.done.wait [#allocation4], 128  }
 0x248   :  { %520 = vsyncadd [#allocation4], 4294967168 }
 0x249   :  { %314 = vsyncpa [#allocation3], 1 }
 0x24a   :  { %315 = vsyncpa [#allocation6], 1 }
 0x24b   :  { %316 = vsyncpa [#allocation4], 1 }

</bundles_post_ra>
